<compile_context>
chip_gen: v6e
topology: v6e:2x2x1
jax: 0.10.0
libtpu: 0.0.40
codegen_flags: <defaults>
</compile_context>

<pallas_src>
import jax
import jax.numpy as jnp
from jax.experimental import pallas as pl
from jax.experimental.pallas import tpu as pltpu

STATE = 4            # state channels: q = x[:, :2], p = x[:, 2:4]
H_V = 32             # hidden width of the potential MLP V(q)
H_K = 32             # hidden width of the damping-gain MLP K(x)
H_ALL = H_V + H_K    # fused hidden rows (64)
N_IN = H_ALL + 8     # 72 = hidden rows + p0/p1 selector rows + sublane padding
M_MASS = 1.0         # mass constant in the damping-injection term


def _softplus(z):
    # Numerically stable softplus using only exp / log / abs / max.
    return jnp.maximum(z, 0.0) + jnp.log(1.0 + jnp.exp(-jnp.abs(z)))


def _control_effort_kernel(x_ref, pin_ref, pout_ref, out_ref):
    """One lane-dense batch tile: out[0, n] = |u0[n]| + |u1[n]|."""
    x_blk = x_ref[...]                            # [TB, 4] f32
    w_in = pin_ref[0:N_IN, :]                     # [72, 4] stacked W1^T / Wk1^T / selectors
    b_in = pin_ref[N_IN:N_IN + H_ALL, 0:1]        # [64, 1] stacked b1 / bk1

    # Stacked input contraction on the MXU, NT form (contract the 4 state
    # channels of both operands) -> channel-first [72, TB], batch on the lanes.
    pre = jax.lax.dot_general(
        w_in, x_blk, (((1,), (1,)), ((), ())),
        preferred_element_type=jnp.float32)       # [72, TB]

    p0 = pre[H_ALL:H_ALL + 1, :]                  # [1, TB] momenta via selector rows
    p1 = pre[H_ALL + 1:H_ALL + 2, :]              # [1, TB]
    h = jnp.tanh(pre[0:H_ALL, :] + b_in)          # [64, TB], lane-dense EUP

    # Rows 0..31 feed the potential gradient via (1 - tanh^2); rows 32..63 feed
    # the damping-gain head directly.  One concat -> one output-side MXU pass.
    g_mat = jnp.concatenate(
        [1.0 - h[0:H_V, :] * h[0:H_V, :], h[H_V:H_ALL, :]], axis=0)   # [64, TB]

    a_out = pout_ref[0:4, :]                      # [4, 64]  (rows 0/1 already = -dV weights)
    bk2 = pout_ref[4:6, 0:1]                      # [2, 1]
    out4 = jnp.dot(a_out, g_mat,
                   preferred_element_type=jnp.float32)                # [4, TB]

    g = _softplus(out4[2:4, :] + bk2)             # [2, TB] positive damping gains
    inv_m = 1.0 / M_MASS
    u0 = out4[0:1, :] - g[0:1, :] * p0 * inv_m    # u = energy_shaping + damping_injection
    u1 = out4[1:2, :] - g[1:2, :] * p1 * inv_m

    # Single unmasked lane-dense store of the whole [1, TB] result tile.
    out_ref[...] = (jnp.abs(u0) + jnp.abs(u1)).astype(out_ref.dtype)


def pack_params(params):
    """Fold / stack the 7 parameter tensors into 2 kernel buffers (do once)."""
    w1, b1, w2, wk1, bk1, wk2, bk2 = [jnp.asarray(p, jnp.float32) for p in params]

    # Input side: [136, 4] = { W_in (72 rows) ; stacked bias in column 0 (64 rows) }.
    w_in = jnp.zeros((N_IN, STATE), jnp.float32)
    w_in = w_in.at[0:H_V, 0:2].set(w1.T)          # V-MLP sees q only (p columns zero)
    w_in = w_in.at[H_V:H_ALL, :].set(wk1.T)       # K-MLP sees the full state
    w_in = w_in.at[H_ALL, 2].set(1.0)             # selector row -> p0
    w_in = w_in.at[H_ALL + 1, 3].set(1.0)         # selector row -> p1
    b_in = jnp.concatenate([b1, bk1])             # [64]
    p_in = jnp.zeros((N_IN + H_ALL, STATE), jnp.float32)
    p_in = p_in.at[0:N_IN, :].set(w_in)
    p_in = p_in.at[N_IN:N_IN + H_ALL, 0].set(b_in)

    # Output side: [8, 64] = { A_out rows 0..3 ; bk2 in column 0 of rows 4/5 }.
    #   rows 0/1: -(W1^T * w2)  -> the dot yields u_es = -dV/dq directly
    #   rows 2/3: Wk2^T         -> damping-gain pre-activation
    a = w1.T * w2[:, 0:1]                         # [32, 2]
    p_out = jnp.zeros((8, H_ALL), jnp.float32)
    p_out = p_out.at[0, 0:H_V].set(-a[:, 0])
    p_out = p_out.at[1, 0:H_V].set(-a[:, 1])
    p_out = p_out.at[2, H_V:H_ALL].set(wk2[:, 0])
    p_out = p_out.at[3, H_V:H_ALL].set(wk2[:, 1])
    p_out = p_out.at[4, 0].set(bk2[0])
    p_out = p_out.at[5, 0].set(bk2[1])
    return p_in, p_out


def _choose_tiling(B):
    """Pad B to a multiple of 256 -> >= 2 lane-dense grid steps (v7x megacore),
    tiles <= 256 lanes so f32 intermediates never spill."""
    b_pad = max(256, pl.cdiv(B, 256) * 256)
    tile = 128 if b_pad == 256 else 256
    return b_pad, tile


def control_effort(t, x, packed_params, *, batch_tile=None):
    """x: [B, 4] float32 (q = x[:, :2], p = x[:, 2:4]). Returns [B, 1].

    `t` is kept for forward(t, x) API fidelity; as in the reference, f is autonomous.
    """
    del t
    p_in, p_out = packed_params
    B, C = x.shape
    assert C == STATE, f"expected {STATE} state channels, got {C}"

    b_pad, tile = _choose_tiling(B)
    if batch_tile is not None:
        tile = batch_tile
        b_pad = pl.cdiv(B, tile) * tile
    grid = (b_pad // tile,)

    x32 = jnp.asarray(x, jnp.float32)
    if b_pad != B:
        x32 = jnp.pad(x32, ((0, b_pad - B), (0, 0)))   # keep stores/DMAs 128-aligned

    cost = pl.CostEstimate(
        flops=int(b_pad * (2 * N_IN * STATE + 2 * 4 * H_ALL + 8 * H_ALL + 32)),
        transcendentals=int(b_pad * (H_ALL + 4)),
        bytes_accessed=int(b_pad * (STATE + 1) * 4),
    )

    out = pl.pallas_call(
        _control_effort_kernel,
        out_shape=jax.ShapeDtypeStruct((1, b_pad), jnp.float32),
        grid_spec=pltpu.PrefetchScalarGridSpec(
            num_scalar_prefetch=0,
            grid=grid,
            in_specs=[
                pl.BlockSpec((tile, STATE), lambda i: (i, 0)),   # x batch tile [TB, 4]
                pl.BlockSpec(p_in.shape, lambda i: (0, 0)),      # packed input-side params
                pl.BlockSpec(p_out.shape, lambda i: (0, 0)),     # packed output-side params
            ],
            out_specs=pl.BlockSpec((1, tile), lambda i: (0, i)),
        ),
        compiler_params=pltpu.CompilerParams(
            dimension_semantics=("parallel",),
        ),
        cost_estimate=cost,
    )(x32, p_in, p_out)

    return out[:, :B].reshape(B, 1)                     # [B, 1] (free reshape)


def _reference(t, x, params):
    """Plain-JAX mirror of the PyTorch forward, for correctness check."""
    del t
    w1, b1, w2, wk1, bk1, wk2, bk2 = params
    q = x[:, :2]
    p = x[:, 2:4]
    h = jnp.tanh(q @ w1 + b1[None, :])                  # [B, H_V]
    dVdq = ((1.0 - h * h) * w2[:, 0][None, :]) @ w1.T   # [B, 2]
    u_es = -dVdq
    hk = jnp.tanh(x @ wk1 + bk1[None, :])               # [B, H_K]
    g = _softplus(hk @ wk2 + bk2[None, :])              # [B, 2]
    u_di = -g * p / M_MASS
    u = u_es + u_di
    return jnp.sum(jnp.abs(u), axis=1, keepdims=True)   # [B, 1]


if __name__ == "__main__":
    key = jax.random.PRNGKey(0)
    ks = jax.random.split(key, 9)

    # Deterministic parameters for V(q) and K(x).
    w1 = 0.5 * jax.random.normal(ks[1], (2, H_V), dtype=jnp.float32)
    b1 = 0.1 * jax.random.normal(ks[2], (H_V,), dtype=jnp.float32)
    w2 = 0.5 * jax.random.normal(ks[3], (H_V, 1), dtype=jnp.float32)
    wk1 = 0.5 * jax.random.normal(ks[4], (STATE, H_K), dtype=jnp.float32)
    bk1 = 0.1 * jax.random.normal(ks[5], (H_K,), dtype=jnp.float32)
    wk2 = 0.5 * jax.random.normal(ks[6], (H_K, 2), dtype=jnp.float32)
    bk2 = 0.1 * jax.random.normal(ks[7], (2,), dtype=jnp.float32)
    params = (w1, b1, w2, wk1, bk1, wk2, bk2)
    packed = pack_params(params)      # one-time packing, outside the per-call path

    t = jnp.float32(0.0)

    # Lane-aligned batch: 256 -> grid=(2,) of 128-lane tiles (both v7x TCs busy).
    B = 256
    x = jax.random.normal(ks[0], (B, STATE), dtype=jnp.float32)
    out = jax.block_until_ready(control_effort(t, x, packed))
    ref = _reference(t, x, params)
    assert out.shape == (B, 1)
    # 1e-3 tolerance leaves headroom for MXU f32 multi-pass accumulation order.
    assert jnp.allclose(out, ref, atol=1e-3, rtol=1e-3), float(
        jnp.max(jnp.abs(out - ref)))

    # Ragged batch: exercises the pad-to-256 + slice path (stores stay unmasked).
    B2 = 200
    x2 = jax.random.normal(ks[8], (B2, STATE), dtype=jnp.float32)
    out2 = jax.block_until_ready(control_effort(t, x2, packed))
    ref2 = _reference(t, x2, params)
    assert out2.shape == (B2, 1)
    assert jnp.allclose(out2, ref2, atol=1e-3, rtol=1e-3), float(
        jnp.max(jnp.abs(out2 - ref2)))

    print("KERNEL_OK")
</pallas_src>

<mosaic_0001>
module attributes {stable_mosaic.version = 11 : i64} {
  func.func @_control_effort_kernel(%arg0: i32, %arg1: memref<128x4xf32, #tpu.memory_space<vmem>>, %arg2: memref<136x4xf32, #tpu.memory_space<vmem>>, %arg3: memref<8x64xf32, #tpu.memory_space<vmem>>, %arg4: memref<1x128xf32, #tpu.memory_space<vmem>>) attributes {dimension_semantics = [#tpu.dimension_semantics<parallel>], iteration_bounds = array<i64: 2>, scalar_prefetch = 0 : i64, scratch_operands = 0 : i64, tpu.core_type = #tpu.core_type<tc>, window_params = [{transform_indices = @transform_0, window_bounds = array<i64: 128, 4>}, {pipeline_mode = #tpu.pipeline_mode<synchronous>, transform_indices = @transform_1, window_bounds = array<i64: 136, 4>}, {pipeline_mode = #tpu.pipeline_mode<synchronous>, transform_indices = @transform_2, window_bounds = array<i64: 8, 64>}, {transform_indices = @transform_3, window_bounds = array<i64: 1, 128>}]} {
    %c0 = arith.constant 0 : index
    %c0_0 = arith.constant 0 : index
    %0 = vector.load %arg1[%c0, %c0_0] : memref<128x4xf32, #tpu.memory_space<vmem>>, vector<128x4xf32>
    %c0_1 = arith.constant 0 : index
    %c0_2 = arith.constant 0 : index
    %1 = vector.load %arg2[%c0_1, %c0_2] : memref<136x4xf32, #tpu.memory_space<vmem>>, vector<72x4xf32>
    %c72 = arith.constant 72 : index
    %c0_3 = arith.constant 0 : index
    %2 = vector.load %arg2[%c72, %c0_3] : memref<136x4xf32, #tpu.memory_space<vmem>>, vector<64x1xf32>
    %cst = arith.constant dense<0.000000e+00> : vector<72x128xf32>
    %3 = tpu.matmul %1, %0, %cst {dimension_numbers = #tpu.dot_dimension_numbers<[1], [1], [0], [0], [0, 0, 1, 0], [], []>} : vector<72x4xf32>, vector<128x4xf32>, vector<72x128xf32> -> vector<72x128xf32>
    %4 = vector.extract_strided_slice %3 {offsets = [64, 0], sizes = [1, 128], strides = [1, 1]} : vector<72x128xf32> to vector<1x128xf32>
    %5 = vector.extract_strided_slice %3 {offsets = [65, 0], sizes = [1, 128], strides = [1, 1]} : vector<72x128xf32> to vector<1x128xf32>
    %6 = vector.extract_strided_slice %3 {offsets = [0, 0], sizes = [64, 128], strides = [1, 1]} : vector<72x128xf32> to vector<64x128xf32>
    %7 = vector.broadcast %2 : vector<64x1xf32> to vector<64x128xf32>
    %8 = arith.addf %6, %7 : vector<64x128xf32>
    %9 = math.tanh %8 : vector<64x128xf32>
    %10 = vector.extract_strided_slice %9 {offsets = [0, 0], sizes = [32, 128], strides = [1, 1]} : vector<64x128xf32> to vector<32x128xf32>
    %11 = vector.extract_strided_slice %9 {offsets = [0, 0], sizes = [32, 128], strides = [1, 1]} : vector<64x128xf32> to vector<32x128xf32>
    %12 = arith.mulf %10, %11 : vector<32x128xf32>
    %cst_4 = arith.constant 1.000000e+00 : f32
    %13 = vector.broadcast %cst_4 : f32 to vector<32x128xf32>
    %14 = arith.subf %13, %12 : vector<32x128xf32>
    %15 = vector.extract_strided_slice %9 {offsets = [32, 0], sizes = [32, 128], strides = [1, 1]} : vector<64x128xf32> to vector<32x128xf32>
    %16 = tpu.concatenate %14, %15 in 0 : vector<32x128xf32>, vector<32x128xf32> -> vector<64x128xf32>
    %c0_5 = arith.constant 0 : index
    %c0_6 = arith.constant 0 : index
    %17 = vector.load %arg3[%c0_5, %c0_6] : memref<8x64xf32, #tpu.memory_space<vmem>>, vector<4x64xf32>
    %c4 = arith.constant 4 : index
    %c0_7 = arith.constant 0 : index
    %18 = vector.load %arg3[%c4, %c0_7] : memref<8x64xf32, #tpu.memory_space<vmem>>, vector<2x1xf32>
    %cst_8 = arith.constant dense<0.000000e+00> : vector<4x128xf32>
    %19 = tpu.matmul %17, %16, %cst_8 {dimension_numbers = #tpu.dot_dimension_numbers<[1], [0], [0], [1], [0, 0, 1, 1], [], []>} : vector<4x64xf32>, vector<64x128xf32>, vector<4x128xf32> -> vector<4x128xf32>
    %20 = vector.extract_strided_slice %19 {offsets = [2, 0], sizes = [2, 128], strides = [1, 1]} : vector<4x128xf32> to vector<2x128xf32>
    %21 = vector.broadcast %18 : vector<2x1xf32> to vector<2x128xf32>
    %22 = arith.addf %20, %21 : vector<2x128xf32>
    %cst_9 = arith.constant 0.000000e+00 : f32
    %23 = vector.broadcast %cst_9 : f32 to vector<2x128xf32>
    %24 = arith.maximumf %22, %23 : vector<2x128xf32>
    %25 = math.absf %22 : vector<2x128xf32>
    %cst_10 = arith.constant 0.000000e+00 : f32
    %26 = vector.broadcast %cst_10 : f32 to vector<2x128xf32>
    %27 = arith.subf %26, %25 : vector<2x128xf32>
    %28 = math.exp %27 : vector<2x128xf32>
    %cst_11 = arith.constant 1.000000e+00 : f32
    %29 = vector.broadcast %cst_11 : f32 to vector<2x128xf32>
    %30 = arith.addf %29, %28 : vector<2x128xf32>
    %31 = math.log %30 : vector<2x128xf32>
    %32 = arith.addf %24, %31 : vector<2x128xf32>
    %33 = vector.extract_strided_slice %19 {offsets = [0, 0], sizes = [1, 128], strides = [1, 1]} : vector<4x128xf32> to vector<1x128xf32>
    %34 = vector.extract_strided_slice %32 {offsets = [0, 0], sizes = [1, 128], strides = [1, 1]} : vector<2x128xf32> to vector<1x128xf32>
    %35 = arith.mulf %34, %4 : vector<1x128xf32>
    %cst_12 = arith.constant 1.000000e+00 : f32
    %36 = vector.broadcast %cst_12 : f32 to vector<1x128xf32>
    %37 = arith.mulf %35, %36 : vector<1x128xf32>
    %38 = arith.subf %33, %37 : vector<1x128xf32>
    %39 = vector.extract_strided_slice %19 {offsets = [1, 0], sizes = [1, 128], strides = [1, 1]} : vector<4x128xf32> to vector<1x128xf32>
    %40 = vector.extract_strided_slice %32 {offsets = [1, 0], sizes = [1, 128], strides = [1, 1]} : vector<2x128xf32> to vector<1x128xf32>
    %41 = arith.mulf %40, %5 : vector<1x128xf32>
    %cst_13 = arith.constant 1.000000e+00 : f32
    %42 = vector.broadcast %cst_13 : f32 to vector<1x128xf32>
    %43 = arith.mulf %41, %42 : vector<1x128xf32>
    %44 = arith.subf %39, %43 : vector<1x128xf32>
    %45 = math.absf %38 : vector<1x128xf32>
    %46 = math.absf %44 : vector<1x128xf32>
    %47 = arith.addf %45, %46 : vector<1x128xf32>
    %c0_14 = arith.constant 0 : index
    %c0_15 = arith.constant 0 : index
    %48 = vector.load %arg4[%c0_14, %c0_15] : memref<1x128xf32, #tpu.memory_space<vmem>>, vector<1x128xf32>
    tpu.vector_store %arg4[%c0_14, %c0_15], %47 {strides = array<i32>} : memref<1x128xf32, #tpu.memory_space<vmem>>, vector<1x128xf32>,
    return
  }
  func.func @transform_0(%arg0: i32) -> (i32, i32) {
    %c0_i32 = arith.constant 0 : i32
    %c0_i32_0 = arith.constant 0 : i32
    return %arg0, %c0_i32 : i32, i32
  }
  func.func @transform_1(%arg0: i32) -> (i32, i32) {
    %c0_i32 = arith.constant 0 : i32
    %c0_i32_0 = arith.constant 0 : i32
    %c0_i32_1 = arith.constant 0 : i32
    return %c0_i32, %c0_i32_0 : i32, i32
  }
  func.func @transform_2(%arg0: i32) -> (i32, i32) {
    %c0_i32 = arith.constant 0 : i32
    %c0_i32_0 = arith.constant 0 : i32
    %c0_i32_1 = arith.constant 0 : i32
    return %c0_i32, %c0_i32_0 : i32, i32
  }
  func.func @transform_3(%arg0: i32) -> (i32, i32) {
    %c0_i32 = arith.constant 0 : i32
    %c0_i32_0 = arith.constant 0 : i32
    return %c0_i32, %arg0 : i32, i32
  }
}

</mosaic_0001>

<bundles_post_ra>
// kernel: tpu_custom_call.1
= control target key start
LH: loop header
LB: loop body
LE: loop exit
PB: predicated region body
PF: predicated region fallthrough
CT: control target
= control target key end

     0   :  { %8 = vsyncpa [#allocation3], 0  ;;  %s1218_s0 = inlined_call_operand.vmem [shape: f32[256,4], index: 0, kind: input, shape index: {}]   ;;  %s1219_s1 = inlined_call_operand.vmem [shape: f32[136,4], index: 1, kind: input, shape index: {}]   ;;  %s1220_s2 = inlined_call_operand.vmem [shape: f32[8,64], index: 2, kind: input, shape index: {}]   ;;  %s1221_s3 = inlined_call_operand.hbm [shape: f32[1,256], index: 3, kind: output, shape index: {}]  }
   0x1   :  { %10 = vsyncpa [#allocation3 + $0x1], 0  ;;  %s956_s12 = smov 0   ;;  %s958_s13 = smov 0  }
   0x2   :  { %s960_s14 = smov 0   ;;  %s962_s15 = smov 0  }
   0x3 LB: > { %s626_s16 = sadd.s32 4294967295, %s930_s15   ;;  %s627_s17 = sadd.s32 4294967294, %s930_s15   ;;  %s930_s15 = sphi %s962_s15, %s1227_s15   ;;  %s926_s14 = sphi %s960_s14, %s1226_s14   ;;  %s922_s13 = sphi %s958_s13, %s1225_s13   ;;  %s918_s12 = sphi %s956_s12, %s1224_s12  }
   0x4   : > { %s979_s18 = sadd.s32 1, %s930_s15   ;;  %s91_s19 = sadd.s32 1, %s926_s14 }
   0x5   : > { %s88_s20 = ssub.s32 %s930_s15, %s979_s18  ;;  %p101_p0 = scmp.ne.s32.totalorder %s926_s14, %s922_s13 }
   0x6   : > { %p89_p1 = scmp.eq.s32.totalorder %s88_s20, 0  ;;  %p102_p2 = scmp.eq.s32.totalorder %s626_s16, 1 }
   0x7   : > { %p107_p3 = scmp.ne.s32.totalorder %s922_s13, %s918_s12  ;;  %p108_p4 = scmp.eq.s32.totalorder %s627_s17, 1 }
   0x8   : > { %s989_s21 = scalar_select %p89_p1, %s926_s14, %s91_s19  }
   0x9   : > { %p991_p5 = por %p102_p2, %p101_p0  ;;  %p995_p6 = por %p108_p4, %p107_p3 }
   0xa   : > { %p630_p7 = scmp.ge.s32.totalorder %s930_s15, 1  ;;  %p141_p8 = scmp.lt.s32.totalorder %s930_s15, 3 }
   0xc   : > { %p142_p9 = pnand %p630_p7, %p141_p8 }
   0xd   : > { %s1001_s24 = sshll.u32 (!%p142_p9), %s626_s16, 4  ;;  %s162_s5 = sand.u32 (!%p142_p9), 1, %s922_s13  }
   0xe   : > { %145 = sbr.rel (%p142_p9) target bundleno = 581 (0x245), region = 32  ;;  %p165_p10 = scmp.lt.s32.totalorder (!%p142_p9), %s1001_s24, 31 }
   0xf   : > { %s163_s7 = scalar_lea.vmem (!%p142_p9), [#allocation2], %s162_s5  ;;  %s570_s10 = scalar_lea.hbm (!%p142_p9), %s1221_s3, %s1001_s24 }
  0x10   : > { %s560_s11 = scalar_lea.sflag (!%p142_p9), [#allocation3], %s162_s5  ;;  %s935_s17 = smov (!%p142_p9), [#allocation2]  }
  0x11   : > { %s874_s19 = sshll.u32 (!%p142_p9), %s935_s17, 4  ;;  %s875_s19 = int_to_ptr.vmem [resolvable:$false] %s874_s19 }
  0x12   : > { %s876_s20 = scalar_lea.vmem (!%p142_p9), %s875_s19, 32 }
  0x13   : > { %v932_v0 = vmov 0.0   ;;  %vm933_vm0 = vmmov 0   ;;  %s166_s25 = scalar_select %p165_p10, %s1001_s24, 31  ;;  %v934_v1 = vmov 0   ;;  %v198_v2 = vld [vmem:[%s1219_s1 + $0x60] sm:$0xff]  ;;  %vm203_vm1 = vcmask 31744  }
  0x14   : > { %696 = vmatprep.subr.mxu0 %v932_v0  ;;  %774 = vmatprep.subr.mxu1 %v932_v0  ;;  %v202_v3 = vld [vmem:[%s1219_s1 + $0x80] sm:$0xff]  ;;  %v200_v5 = vld [vmem:[%s1219_s1 + $0x70] sm:$0xff]  ;;  %v201_v6 = vld [vmem:[%s1219_s1 + $0x78] sm:$0xff]  ;;  %vm455_vm2 = vcmask 523264  }
  0x15   : > { %728 = vmatprep.mubr.msk.f32.mxu0 %vm933_vm0, %v932_v0  ;;  %743 = vmatprep.mubr.msk.f32.mxu1 %vm933_vm0, %v932_v0  ;;  %s632_s30 = sshll.u32 %s166_s25, 3  ;;  %v199_v8 = vld [vmem:[%s1219_s1 + $0x68] sm:$0xff]  ;;  %v197_v9 = vld [vmem:[%s1219_s1 + $0x58] sm:$0xff]  ;;  %v196_v12 = vld [vmem:[%s1219_s1 + $0x50] sm:$0xff] }
  0x16   : > { %849 = vset.pattern.permute.xlu1 %v934_v1  ;;  %848 = vset.pattern.permute.xlu0 %v934_v1  ;;  %s1020_s6 = scalar_lea.vmem %s1218_s0, %s632_s30  ;;  %v195_v11 = vld [vmem:[%s1219_s1 + $0x48] sm:$0xff]  ;;  %v454_v14 = vld [vmem:[%s1220_s2 + $0x4] sm:$0x3]  ;;  %v192_v30 = vld [vmem:[%s1219_s1 + $0x30] sm:$0xff] }
  0x17   : > { %406 = vperm.xlu1 %849, %v198_v2   ;;  %426 = vperm.xlu0 %848, %v202_v3   ;;  %v185_v4 = vld [vmem:[%s1020_s6 + $0x78] sm:$0xff]  ;;  %v184_v7 = vld [vmem:[%s1020_s6 + $0x70] sm:$0xff]  ;;  %v183_v10 = vld [vmem:[%s1020_s6 + $0x68] sm:$0xff] }
  0x18   : > { %697 = vmatpush3.xpose.msk.msra.mxu0 %vm203_vm1, %v185_v4  ;;  %790 = vmatpush3.xpose.msk.msra.mxu1 %vm203_vm1, %v185_v4  ;;  %v182_v13 = vld [vmem:[%s1020_s6 + $0x60] sm:$0xff]  ;;  %v181_v15 = vld [vmem:[%s1020_s6 + $0x58] sm:$0xff]  ;;  %v180_v16 = vld [vmem:[%s1020_s6 + $0x50] sm:$0xff] }
  0x19   : > { %698 = vmatprep.subr.mxu0 %v932_v0  ;;  %775 = vmatprep.subr.mxu1 %v932_v0  ;;  %v179_v17 = vld [vmem:[%s1020_s6 + $0x48] sm:$0xff]  ;;  %v178_v18 = vld [vmem:[%s1020_s6 + $0x40] sm:$0xff]  ;;  %v177_v19 = vld [vmem:[%s1020_s6 + $0x38] sm:$0xff] }
  0x1a   : > { %v176_v20 = vld [vmem:[%s1020_s6 + $0x30] sm:$0xff]  ;;  %v175_v21 = vld [vmem:[%s1020_s6 + $0x28] sm:$0xff]  ;;  %v174_v22 = vld [vmem:[%s1020_s6 + $0x20] sm:$0xff] }
  0x1b   : > { %416 = vperm.xlu1 %849, %v200_v5   ;;  %421 = vperm.xlu0 %848, %v201_v6   ;;  %v173_v23 = vld [vmem:[%s1020_s6 + $0x18] sm:$0xff]  ;;  %v172_v24 = vld [vmem:[%s1020_s6 + $0x10] sm:$0xff]  ;;  %v171_v25 = vld [vmem:[%s1020_s6 + $0x8] sm:$0xff] }
  0x1c   : > { %699 = vmatpush3.xpose.msk.msra.mxu0 %vm203_vm1, %v184_v7  ;;  %791 = vmatpush3.xpose.msk.msra.mxu1 %vm203_vm1, %v184_v7  ;;  %v170_v26 = vld [vmem:[%s1020_s6] sm:$0xff]  ;;  %v191_v28 = vld [vmem:[%s1219_s1 + $0x28] sm:$0xff]  ;;  %v188_v31 = vld [vmem:[%s1219_s1 + $0x10] sm:$0xff]  ;;  %s572_s6 = sshll.u32 %s163_s7, 4  ;;  %s573_s6 = int_to_ptr.vmem [resolvable:$true] %s572_s6 }
  0x1d   : > { %700 = vmatprep.subr.mxu0 %v932_v0  ;;  %776 = vmatprep.subr.mxu1 %v932_v0  ;;  %v186_v27 = vld [vmem:[%s1219_s1] sm:$0xff]  ;;  %v187_v29 = vld [vmem:[%s1219_s1 + $0x8] sm:$0xff]  ;;  %v193_v32 = vld [vmem:[%s1219_s1 + $0x38] sm:$0xff]  ;;  %s870_s16 = scalar_lea.vmem %s573_s6, 16  ;;  %p877_p0 = scmp.lt.s32.totalorder %s573_s6, %s875_s19 }
  0x1e   : > { %v189_v33 = vld [vmem:[%s1219_s1 + $0x18] sm:$0xff]  ;;  %v190_v34 = vld [vmem:[%s1219_s1 + $0x20] sm:$0xff]  ;;  %p871_p11 = scmp.ne.s32.totalorder %s573_s6, %s870_s16  ;;  %p878_p1 = scmp.lt.s32.totalorder %s876_s20, %s870_s16 }
  0x1f   : > { %411 = vperm.xlu1 %849, %v199_v8   ;;  %401 = vperm.xlu0 %848, %v197_v9   ;;  %v194_v35 = vld [vmem:[%s1219_s1 + $0x40] sm:$0xff] }
  0x20   : > { %701 = vmatpush3.xpose.msk.msra.mxu0 %vm203_vm1, %v183_v10  ;;  %792 = vmatpush3.xpose.msk.msra.mxu1 %vm203_vm1, %v183_v10  ;;  %p872_p12 = pnand %p871_p11, %p991_p5  ;;  %p879_p2 = por %p878_p1, %p877_p0 }
  0x21   : > { %702 = vmatprep.subr.mxu0 %v932_v0  ;;  %777 = vmatprep.subr.mxu1 %v932_v0 }
  0x22   : > { %p873_p13 = pneg %p872_p12 }
  0x23   : > { %391 = vperm.xlu1 %849, %v195_v11   ;;  %396 = vperm.xlu0 %848, %v196_v12  }
  0x24   : > { %703 = vmatpush3.xpose.msk.msra.mxu0 %vm203_vm1, %v182_v13  ;;  %793 = vmatpush3.xpose.msk.msra.mxu1 %vm203_vm1, %v182_v13  ;;  %p880_p3 = pnand %p879_p2, %p873_p13 }
  0x25   : > { %704 = vmatprep.subr.mxu0 %v932_v0  ;;  %778 = vmatprep.subr.mxu1 %v932_v0 }
  0x27   : > { %531 = vperm.xlu0 %848, %v454_v14  }
  0x28   : > { %705 = vmatpush3.xpose.msk.msra.mxu0 %vm203_vm1, %v181_v15  ;;  %794 = vmatpush3.xpose.msk.msra.mxu1 %vm203_vm1, %v181_v15 }
  0x29   : > { %706 = vmatprep.subr.mxu0 %v932_v0  ;;  %779 = vmatprep.subr.mxu1 %v932_v0 }
  0x2c   : > { %707 = vmatpush3.xpose.msk.msra.mxu0 %vm203_vm1, %v180_v16  ;;  %795 = vmatpush3.xpose.msk.msra.mxu1 %vm203_vm1, %v180_v16 }
  0x2d   : > { %708 = vmatprep.subr.mxu0 %v932_v0  ;;  %780 = vmatprep.subr.mxu1 %v932_v0 }
  0x30   : > { %709 = vmatpush3.xpose.msk.msra.mxu0 %vm203_vm1, %v179_v17  ;;  %796 = vmatpush3.xpose.msk.msra.mxu1 %vm203_vm1, %v179_v17 }
  0x31   : > { %710 = vmatprep.subr.mxu0 %v932_v0  ;;  %781 = vmatprep.subr.mxu1 %v932_v0 }
  0x34   : > { %711 = vmatpush3.xpose.msk.msra.mxu0 %vm203_vm1, %v178_v18  ;;  %797 = vmatpush3.xpose.msk.msra.mxu1 %vm203_vm1, %v178_v18 }
  0x35   : > { %712 = vmatprep.subr.mxu0 %v932_v0  ;;  %782 = vmatprep.subr.mxu1 %v932_v0 }
  0x38   : > { %713 = vmatpush3.xpose.msk.msra.mxu0 %vm203_vm1, %v177_v19  ;;  %798 = vmatpush3.xpose.msk.msra.mxu1 %vm203_vm1, %v177_v19 }
  0x39   : > { %714 = vmatprep.subr.mxu0 %v932_v0  ;;  %783 = vmatprep.subr.mxu1 %v932_v0 }
  0x3c   : > { %715 = vmatpush3.xpose.msk.msra.mxu0 %vm203_vm1, %v176_v20  ;;  %799 = vmatpush3.xpose.msk.msra.mxu1 %vm203_vm1, %v176_v20 }
  0x3d   : > { %716 = vmatprep.subr.mxu0 %v932_v0  ;;  %784 = vmatprep.subr.mxu1 %v932_v0 }
  0x40   : > { %717 = vmatpush3.xpose.msk.msra.mxu0 %vm203_vm1, %v175_v21  ;;  %800 = vmatpush3.xpose.msk.msra.mxu1 %vm203_vm1, %v175_v21  ;;  %v453_v21 = vld [vmem:[%s1220_s2] sm:$0xf] }
  0x41   : > { %718 = vmatprep.subr.mxu0 %v932_v0  ;;  %785 = vmatprep.subr.mxu1 %v932_v0 }
  0x44   : > { %719 = vmatpush3.xpose.msk.msra.mxu0 %vm203_vm1, %v174_v22  ;;  %801 = vmatpush3.xpose.msk.msra.mxu1 %vm203_vm1, %v174_v22 }
  0x45   : > { %720 = vmatprep.subr.mxu0 %v932_v0  ;;  %786 = vmatprep.subr.mxu1 %v932_v0 }
  0x48   : > { %721 = vmatpush3.xpose.msk.msra.mxu0 %vm203_vm1, %v173_v23  ;;  %802 = vmatpush3.xpose.msk.msra.mxu1 %vm203_vm1, %v173_v23 }
  0x49   : > { %722 = vmatprep.subr.mxu0 %v932_v0  ;;  %787 = vmatprep.subr.mxu1 %v932_v0 }
  0x4c   : > { %723 = vmatpush3.xpose.msk.msra.mxu0 %vm203_vm1, %v172_v24  ;;  %803 = vmatpush3.xpose.msk.msra.mxu1 %vm203_vm1, %v172_v24 }
  0x4d   : > { %724 = vmatprep.subr.mxu0 %v932_v0  ;;  %788 = vmatprep.subr.mxu1 %v932_v0 }
  0x50   : > { %725 = vmatpush3.xpose.msk.msra.mxu0 %vm203_vm1, %v171_v25  ;;  %804 = vmatpush3.xpose.msk.msra.mxu1 %vm203_vm1, %v171_v25 }
  0x51   : > { %726 = vmatprep.subr.mxu0 %v932_v0  ;;  %789 = vmatprep.subr.mxu1 %v932_v0 }
  0x54   : > { %727 = vmatpush3.xpose.msk.msra.mxu0 %vm203_vm1, %v170_v26  ;;  %805 = vmatpush3.xpose.msk.msra.mxu1 %vm203_vm1, %v170_v26 }
  0x55   : > { %755 = vmatprep.subr.mxu1 %v932_v0 }
  0x57   : > { %729 = vmatmul.mubr.msk.f32.vlgmr.msra.gmra.mxu0 %vm203_vm1, %v186_v27  ;;  %744 = vmatmul.mubr.msk.f32.vlgmr.msra.gmra.mxu1 %vm203_vm1, %v191_v28 }
  0x58   : > { %731 = vmatprep.mubr.msk.f32.mxu0 %vm933_vm0, %v932_v0  ;;  %746 = vmatprep.mubr.msk.f32.mxu1 %vm933_vm0, %v932_v0 }
  0x5b   : > { %732 = vmatmul.mubr.msk.f32.gmra.mxu0 %vm203_vm1, %v187_v29  ;;  %747 = vmatmul.mubr.msk.f32.gmra.mxu1 %vm203_vm1, %v192_v30 }
  0x5c   : > { %734 = vmatprep.mubr.msk.f32.mxu0 %vm933_vm0, %v932_v0  ;;  %749 = vmatprep.mubr.msk.f32.mxu1 %vm933_vm0, %v932_v0 }
  0x5f   : > { %735 = vmatmul.mubr.msk.f32.gmra.mxu0 %vm203_vm1, %v188_v31  ;;  %750 = vmatmul.mubr.msk.f32.gmra.mxu1 %vm203_vm1, %v193_v32 }
  0x60   : > { %737 = vmatprep.mubr.msk.f32.mxu0 %vm933_vm0, %v932_v0  ;;  %752 = vmatprep.mubr.msk.f32.mxu1 %vm933_vm0, %v932_v0 }
  0x63   : > { %738 = vmatmul.mubr.msk.f32.gmra.mxu0 %vm203_vm1, %v189_v33  ;;  %753 = vmatmul.mubr.msk.f32.gmra.mxu1 %vm203_vm1, %v194_v35 }
  0x64   : > { %740 = vmatprep.mubr.msk.f32.mxu0 %vm933_vm0, %v932_v0  ;;  %771 = vmatprep.mubr.msk.f32.mxu1 %vm933_vm0, %v932_v0 }
  0x67   : > { %741 = vmatmul.mubr.msk.f32.gmra.mxu0 %vm203_vm1, %v190_v34 }
  0x92   : > { %v407_v36 = vpop.permute.xlu1 %406  ;;  %v427_v37 = vpop.permute.xlu0 %426 }
  0x96   : > { %v417_v38 = vpop.permute.xlu1 %416  ;;  %v422_v39 = vpop.permute.xlu0 %421 }
  0x9a   : > { %v412_v46 = vpop.permute.xlu1 %411  ;;  %v402_v47 = vpop.permute.xlu0 %401 }
  0x9e   : > { %v392_v57 = vpop.permute.xlu1 %391  ;;  %v397_v59 = vpop.permute.xlu0 %396 }
  0xa2   : > { %v532_v24 = vpop.permute.xlu0 %531 }
  0xa3   : > { %v533_v25 = vrot.slane %v532_v24, 6 }
 0x117   : > { %v345_v40 = vpop.f32.mrf.mxu0  ;;  %v370_v41 = vpop.f32.mrf.mxu1 }
 0x118   : > { %v434_v58 = vadd.f32 %v417_v38, %v370_v41  ;;  %v429_v63 = vadd.f32 %v392_v57, %v345_v40 }
 0x119   : > { %v730_v42 = vpop.f32.mrf.mxu0  ;;  %v745_v43 = vpop.f32.mrf.mxu1 }
 0x11b   : > { %v350_v44 = vpop.f32.mrf.mxu0  ;;  %v375_v45 = vpop.f32.mrf.mxu1 }
 0x11c   : > { %v435_v52 = vadd.f32 %v422_v39, %v375_v45  ;;  %v430_v61 = vadd.f32 %v397_v59, %v350_v44 }
 0x11d   : > { %v733_v48 = vpop.f32.mrf.mxu0  ;;  %v748_v49 = vpop.f32.mrf.mxu1 }
 0x11f   : > { %v355_v50 = vpop.f32.mrf.mxu0  ;;  %v380_v51 = vpop.f32.mrf.mxu1 }
 0x120   : > { %v436_v53 = vadd.f32 %v427_v37, %v380_v51  ;;  %v431_v54 = vadd.f32 %v402_v47, %v355_v50 }
 0x121   : > { %v736_v55 = vpop.f32.mrf.mxu0  ;;  %v751_v56 = vpop.f32.mrf.mxu1 }
 0x122   : > { %850 = vtanh.f32 %v436_v53 }
 0x123   : > { %v360_v60 = vpop.f32.mrf.mxu0  ;;  %852 = vtanh.f32 %v435_v52  ;;  %v385_v22 = vpop.f32.mrf.mxu1 }
 0x124   : > { %v432_v62 = vadd.f32 %v407_v36, %v360_v60  ;;  %854 = vtanh.f32 %v431_v54  ;;  %v546_v36 = vrot.slane %v385_v22, 6 }
 0x125   : > { %v739_v1 = vpop.f32.mrf.mxu0  ;;  %v754_v23 = vpop.f32.mrf.mxu1 }
 0x126   : > { %856 = vtanh.f32 %v432_v62 }
 0x127   : > { %858 = vtanh.f32 %v434_v58  ;;  %v365_v2 = vpop.f32.mrf.mxu0 }
 0x128   : > { %860 = vtanh.f32 %v430_v61  ;;  %v433_v3 = vadd.f32 %v412_v46, %v365_v2 }
 0x129   : > { %862 = vtanh.f32 %v429_v63  ;;  %v742_v4 = vpop.f32.mrf.mxu0 }
 0x12a   : > { %864 = vtanh.f32 %v433_v3 }
 0x12f   : > { %v851_v5 = vpop.eup %850 }
 0x130   : > { %v853_v6 = vpop.eup %852  ;;  %756 = vmatpush3.msra.mxu1 %v851_v5 }
 0x131   : > { %v855_v7 = vpop.eup %854  ;;  %757 = vmatprep.subr.mxu1 %v932_v0 }
 0x132   : > { %758 = vmatpush3.msra.mxu1 %v853_v6  ;;  %v447_v13 = vmul.f32 %v855_v7, %v855_v7 }
 0x133   : > { %v857_v8 = vpop.eup %856  ;;  %759 = vmatprep.subr.mxu1 %v932_v0 }
 0x134   : > { %v859_v9 = vpop.eup %858  ;;  %v448_v10 = vmul.f32 %v857_v8, %v857_v8  ;;  %v451_v18 = vsub.f32 1.0, %v447_v13 }
 0x135   : > { %v861_v11 = vpop.eup %860  ;;  %760 = vmatpush3.msra.mxu1 %v859_v9 }
 0x136   : > { %v863_v12 = vpop.eup %862  ;;  %761 = vmatprep.subr.mxu1 %v932_v0  ;;  %v446_v15 = vmul.f32 %v861_v11, %v861_v11  ;;  %v452_v16 = vsub.f32 1.0, %v448_v10 }
 0x137   : > { %v865_v14 = vpop.eup %864  ;;  %v445_v17 = vmul.f32 %v863_v12, %v863_v12 }
 0x138   : > { %762 = vmatpush3.msra.mxu1 %v865_v14  ;;  %v450_v19 = vsub.f32 1.0, %v446_v15 }
 0x139   : > { %763 = vmatprep.subr.mxu1 %v932_v0  ;;  %v449_v20 = vsub.f32 1.0, %v445_v17 }
 0x13a   : > { %764 = vmatpush3.msra.mxu1 %v452_v16 }
 0x13b   : > { %765 = vmatprep.subr.mxu1 %v932_v0 }
 0x13c   : > { %766 = vmatpush3.msra.mxu1 %v451_v18 }
 0x13d   : > { %767 = vmatprep.subr.mxu1 %v932_v0 }
 0x13e   : > { %768 = vmatpush3.msra.mxu1 %v450_v19 }
 0x13f   : > { %769 = vmatprep.subr.mxu1 %v932_v0 }
 0x140   : > { %770 = vmatpush3.msra.mxu1 %v449_v20 }
 0x141   : > { %772 = vmatmul.mubr.msk.f32.vlgmr.msra.gmra.mxu1 %vm455_vm2, %v453_v21 }
 0x201   : > { %v525_v26 = vpop.f32.mrf.mxu1 }
 0x202   : > { %v535_v27 = vadd.f32 %v533_v25, %v525_v26 }
 0x203   : > { %v773_v28 = vpop.f32.mrf.mxu1 }
 0x204   : > { %v537_v29 = vand.u32 2147483647, %v535_v27  ;;  %v536_v0 = vmax.f32 %v535_v27, 0.0 }
 0x206   : > { %v538_v30 = vsub.f32 0.0, %v537_v29 }
 0x208   : > { %v539_v31 = vmul.f32 1.442695, %v538_v30 }
 0x20a   : > { %866 = vpow2.f32 %v539_v31 }
 0x217   : > { %v867_v32 = vpop.eup %866 }
 0x218   : > { %v541_v33 = vadd.f32 1.0, %v867_v32 }
 0x21a   : > { %868 = vlog2.f32 %v541_v33 }
 0x227   : > { %v869_v34 = vpop.eup %868 }
 0x228   : > { %v543_v35 = vmul.f32 0.6931472, %v869_v34 }
 0x22a   : > { %v544_v37 = vadd.f32 %v543_v35, %v536_v0 }
 0x22c   : > { %v548_v38 = vmul.f32 %v546_v36, %v544_v37 }
 0x22e   : > { %v550_v39 = vrot.slane %v548_v38, 2 }
 0x230   : > { %v552_v40 = vsub.f32 %v525_v26, %v550_v39 }
 0x232   : > { %v553_v41 = vand.u32 2147483647, %v552_v40 }
 0x234   : > { %v555_v42 = vrot.slane %v553_v41, 1 }
 0x236   : > { %v557_v43 = vadd.f32 %v555_v42, %v553_v41 }
 0x238   : > { %558 = vst [vmem:[%s163_s7] sm:$0x1] %v557_v43 }
 0x239   : > { %883 = shalt.err (!%p880_p3)
}
 0x23a   : > { %s884_s25 = scalar_lea.hbm %s570_s10, 16  ;;  %s888_s27 = scalar_lea.hbm %s1221_s3, 32 }
 0x23b   : > { %p885_p4 = scmp.ne.s32.totalorder %s570_s10, %s884_s25  ;;  %p889_p9 = scmp.lt.s32.totalorder %s570_s10, %s1221_s3 }
 0x23c   : > { %p890_p10 = scmp.lt.s32.totalorder %s888_s27, %s884_s25 }
 0x23d   : > { %p886_p7 = pnand %p885_p4, %p991_p5 }
 0x23e   : > { %p891_p11 = por %p890_p10, %p889_p9 }
 0x23f   : > { %p887_p8 = pneg %p886_p7 }
 0x241   : > { %p892_p12 = pnand %p891_p11, %p887_p8 }
 0x243   : > { %895 = shalt.err (!%p892_p12)
}
 0x244   : > { %806 = dma.vmem_to_hbm [thread:$0]  (%p991_p5), %s573_s6, 16, %s570_s10, %s560_s11  }
 0x245 PF: > { %p812_p13 = scmp.ge.s32.totalorder %s930_s15, 2  ;;  %s584_s30 = sand.u32 1, %s918_s12  }
 0x246   : > { %s585_s4 = scalar_lea.sflag [#allocation3], %s584_s30 }
 0x247   : > { %p809_p0 = pnand %p812_p13, %p995_p6 }
 0x249   : > { %p810_p1 = pneg %p809_p0 }
 0x24b   : > { %913 = dma.done.wait (%p810_p1), %s585_s4, 16  }
 0x24c   : > { %915 = vsyncadd (%p810_p1), %s585_s4, 4294967280  ;;  %p13_p2 = scmp.ge.s32.totalorder %s979_s18, 4   ;;  %s1224_s12 = smov %s922_s13 }
 0x24d   : > { %s1225_s13 = smov %s926_s14  ;;  %s1226_s14 = smov %s989_s21 }
 0x24e   : > { %s1227_s15 = smov %s979_s18  ;;  %15 = sbr.rel (!%p13_p2) target bundleno = 3 (0x3), region = 67 }
 0x253   :  { %589 = vsyncpa [#allocation3], 1 }
 0x254   :  { %591 = vsyncpa [#allocation3 + $0x1], 1 }

</bundles_post_ra>
